<compile_context>
chip_gen: v7x
topology: tpu7x:2x2x1
jax: 0.10.0
libtpu: 0.0.40
codegen_flags: <defaults>
</compile_context>

<pallas_src>
import jax
import jax.numpy as jnp
from jax.experimental import pallas as pl
from jax.experimental.pallas import tpu as pltpu

# TODO(synk): `size` is an undefined global in the PyTorch spec; pinned here.
SIZE = 6


def _make_kernel(n_in, counts, offsets):
    """counts[i]/offsets[i]: channels used from input i and their offset in
    the first `size` channels of the concatenation."""

    def kernel(*refs):
        out_ref = refs[n_in]                     # (N, size, block_hw); dup dim squeezed
        for i in range(n_in):                    # small static loop over inputs
            use, off = counts[i], offsets[i]
            # Static ref views: the channel trim costs nothing extra here.
            out_ref[:, off:off + use, :] = refs[i][:, :use, :]

    return kernel


def cat_slice_cat(input_tensors, size=SIZE):
    """input_tensors: list of NCHW arrays with identical N, H, W."""
    n, _, h, w = input_tensors[0].shape
    dtype = input_tensors[0].dtype
    hw = h * w

    total_c = sum(int(t.shape[1]) for t in input_tensors)
    size = min(size, total_c)            # PyTorch slice semantics clamp
    if size <= 0:
        return jnp.zeros((n, 0, h, w), dtype=dtype)

    # Keep only inputs that contribute to the first `size` channels.  They are
    # passed UNSLICED (no wrapper copy); the trim happens inside the kernel.
    used, counts, offsets = [], [], []
    off = 0
    for t in input_tensors:
        if off >= size:
            break
        c = int(t.shape[1])
        use = min(c, size - off)
        used.append(t.reshape(n, c, hw))          # free reshape, no data movement
        counts.append(use)
        offsets.append(off)
        off += use

    itemsize = jnp.dtype(dtype).itemsize
    in_c_total = sum(int(t.shape[1]) for t in used)

    # Pick the HW (lane) block: largest that keeps the double-buffered
    # resident footprint under ~12 MiB (safe vs. every generation's scoped
    # VMEM default, incl. v7x's 64 MiB physical).  Multiple of 128, or the
    # full HW extent (legal even when HW % 128 != 0 -> no wrapper pad needed).
    per_lane_bytes = 2 * (n * in_c_total + n * size) * itemsize
    lanes_budget = max(128, (12 << 20) // max(per_lane_bytes, 1))
    if hw <= lanes_budget:
        block_hw = hw                              # single lane block (full dim)
    else:
        block_hw = max(128, (min(hw, lanes_budget) // 128) * 128)
    n_hw = pl.cdiv(hw, block_hw)

    # Grid: (hw blocks, dup).  dup is the fastest axis so input blocks stay
    # resident across the two dup steps (inputs DMA'd from HBM exactly once).
    in_specs = [
        pl.BlockSpec((n, int(t.shape[1]), block_hw), lambda hb, d: (0, 0, hb))
        for t in used
    ]
    out_spec = pl.BlockSpec((n, None, size, block_hw),
                            lambda hb, d: (0, d, 0, hb))

    bytes_accessed = (n * in_c_total * hw + n * 2 * size * hw) * itemsize

    out = pl.pallas_call(
        _make_kernel(len(used), tuple(counts), tuple(offsets)),
        out_shape=jax.ShapeDtypeStruct((n, 2, size, hw), dtype),
        grid=(n_hw, 2),
        in_specs=in_specs,
        out_specs=out_spec,
        compiler_params=pltpu.CompilerParams(
            dimension_semantics=("parallel", "arbitrary"),
            vmem_limit_bytes=32 << 20,
        ),
        cost_estimate=pl.CostEstimate(
            flops=0, transcendentals=0, bytes_accessed=bytes_accessed
        ),
    )(*used)

    # (N, 2, size, HW) -> (N, 2*size, H, W): contiguous-dim flatten/split, free.
    return out.reshape(n, 2 * size, h, w)


def _reference(input_tensors, size=SIZE):
    x = jnp.concatenate(input_tensors, axis=1)
    x = x[:, :size]
    return jnp.concatenate([x, x], axis=1)


if __name__ == "__main__":
    key = jax.random.PRNGKey(0)
    k1, k2 = jax.random.split(key)
    # two input tensors, each (N=2, C=4, H=16, W=16) -> cat gives C=8 >= SIZE=6
    a = jax.random.normal(k1, (2, 4, 16, 16), dtype=jnp.float32)
    b = jax.random.normal(k2, (2, 4, 16, 16), dtype=jnp.float32)
    inputs = [a, b]

    out = jax.block_until_ready(cat_slice_cat(inputs))

    ref = _reference(inputs)
    assert out.shape == (2, 2 * SIZE, 16, 16), out.shape
    assert jnp.allclose(out, ref), "mismatch vs reference"

    print("KERNEL_OK")
</pallas_src>

<mosaic_0001>
module attributes {stable_mosaic.version = 11 : i64} {
  func.func @kernel(%arg0: i32, %arg1: i32, %arg2: memref<2x4x256xf32, #tpu.memory_space<vmem>>, %arg3: memref<2x4x256xf32, #tpu.memory_space<vmem>>, %arg4: memref<2x1x6x256xf32, #tpu.memory_space<vmem>>) attributes {dimension_semantics = [#tpu.dimension_semantics<parallel>, #tpu.dimension_semantics<arbitrary>], iteration_bounds = array<i64: 1, 2>, scalar_prefetch = 0 : i64, scratch_operands = 0 : i64, tpu.core_type = #tpu.core_type<tc>, window_params = [{transform_indices = @transform_0, window_bounds = array<i64: 2, 4, 256>}, {transform_indices = @transform_1, window_bounds = array<i64: 2, 4, 256>}, {transform_indices = @transform_2, window_bounds = array<i64: 2, 1, 6, 256>}]} {
    %c0 = arith.constant 0 : index
    %c0_0 = arith.constant 0 : index
    %c0_1 = arith.constant 0 : index
    %0 = vector.load %arg2[%c0, %c0_0, %c0_1] : memref<2x4x256xf32, #tpu.memory_space<vmem>>, vector<2x4x256xf32>
    %c0_2 = arith.constant 0 : index
    %c0_3 = arith.constant 0 : index
    %c0_4 = arith.constant 0 : index
    %c0_5 = arith.constant 0 : index
    %1 = vector.load %arg4[%c0_2, %c0_3, %c0_4, %c0_5] : memref<2x1x6x256xf32, #tpu.memory_space<vmem>>, vector<2x1x4x256xf32>
    %2 = vector.shape_cast %1 : vector<2x1x4x256xf32> to vector<2x4x256xf32>
    %3 = vector.shape_cast %0 : vector<2x4x256xf32> to vector<2x1x4x256xf32>
    tpu.vector_store %arg4[%c0_2, %c0_3, %c0_4, %c0_5], %3 {strides = array<i32>} : memref<2x1x6x256xf32, #tpu.memory_space<vmem>>, vector<2x1x4x256xf32>,
    %c0_6 = arith.constant 0 : index
    %c0_7 = arith.constant 0 : index
    %c0_8 = arith.constant 0 : index
    %4 = vector.load %arg3[%c0_6, %c0_7, %c0_8] : memref<2x4x256xf32, #tpu.memory_space<vmem>>, vector<2x2x256xf32>
    %c0_9 = arith.constant 0 : index
    %c0_10 = arith.constant 0 : index
    %c4 = arith.constant 4 : index
    %c0_11 = arith.constant 0 : index
    %5 = vector.load %arg4[%c0_9, %c0_10, %c4, %c0_11] : memref<2x1x6x256xf32, #tpu.memory_space<vmem>>, vector<2x1x2x256xf32>
    %6 = vector.shape_cast %5 : vector<2x1x2x256xf32> to vector<2x2x256xf32>
    %7 = vector.shape_cast %4 : vector<2x2x256xf32> to vector<2x1x2x256xf32>
    tpu.vector_store %arg4[%c0_9, %c0_10, %c4, %c0_11], %7 {strides = array<i32>} : memref<2x1x6x256xf32, #tpu.memory_space<vmem>>, vector<2x1x2x256xf32>,
    return
  }
  func.func @transform_0(%arg0: i32, %arg1: i32) -> (i32, i32, i32) {
    %c0_i32 = arith.constant 0 : i32
    %c0_i32_0 = arith.constant 0 : i32
    %c0_i32_1 = arith.constant 0 : i32
    return %c0_i32, %c0_i32_0, %arg0 : i32, i32, i32
  }
  func.func @transform_1(%arg0: i32, %arg1: i32) -> (i32, i32, i32) {
    %c0_i32 = arith.constant 0 : i32
    %c0_i32_0 = arith.constant 0 : i32
    %c0_i32_1 = arith.constant 0 : i32
    return %c0_i32, %c0_i32_0, %arg0 : i32, i32, i32
  }
  func.func @transform_2(%arg0: i32, %arg1: i32) -> (i32, i32, i32, i32) {
    %c0_i32 = arith.constant 0 : i32
    %c0_i32_0 = arith.constant 0 : i32
    %c0_i32_1 = arith.constant 0 : i32
    return %c0_i32, %arg1, %c0_i32_0, %arg0 : i32, i32, i32, i32
  }
}

</mosaic_0001>

<bundles_post_ra>
// kernel: tpu_custom_call.1
= control target key start
LH: loop header
LB: loop body
LE: loop exit
PB: predicated region body
PF: predicated region fallthrough
CT: control target
= control target key end

     0   :  { %7 = vsyncpa [#allocation3], 0  ;;  %s654_s0 = inlined_call_operand.hbm [shape: f32[2,4,256], index: 0, kind: input, shape index: {}]   ;;  %s655_s1 = inlined_call_operand.hbm [shape: f32[2,4,256], index: 1, kind: input, shape index: {}]   ;;  %s656_s2 = inlined_call_operand.vmem [shape: f32[2,2,6,256], index: 2, kind: output, shape index: {}]  }
   0x1   :  { %8 = vsyncpa [#allocation5], 0  ;;  %s521_s9 = smov 0   ;;  %s523_s10 = smov 0  }
   0x2   :  { %s525_s11 = smov 0   ;;  %s527_s12 = smov 0  }
   0x3   :  { %s529_s13 = smov 0  }
   0x4 LB: > { %s316_s14 = sadd.s32 4294967295, %s500_s13   ;;  %s23_s15 = sadd.s32 1, %s496_s12  ;;  %s500_s13 = sphi %s529_s13, %s14_s13   ;;  %s496_s12 = sphi %s527_s12, %s670_s12   ;;  %s492_s11 = sphi %s525_s11, %s669_s11   ;;  %s488_s10 = sphi %s523_s10, %s668_s10   ;;  %s484_s9 = sphi %s521_s9, %s667_s9  }
   0x5   : > { %p24_p0 = scmp.ge.s32.totalorder %s23_s15, 2  ;;  %s87_s16 = sadd.s32 1, %s488_s10 }
   0x6   : > { %p97_p1 = scmp.ne.s32.totalorder %s488_s10, %s484_s9  ;;  %p98_p2 = scmp.eq.s32.totalorder %s316_s14, 1 }
   0x7   : > { %s672_s15 = smov (%p24_p0, %s23_s15), 0  ;;  %p318_p4 = scmp.ge.s32.totalorder %s500_s13, 1 }
   0x8   : > { %p553_p3 = por %p98_p2, %p97_p1  ;;  %s82_s18 = ssub.s32 %s496_s12, %s672_s15 }
   0x9   : > { %p111_p5 = scmp.lt.s32.totalorder %s500_s13, 3  ;;  %p85_p6 = scmp.eq.s32.totalorder %s82_s18, 0 }
   0xa   : > { %s660_s17 = scalar_select %p553_p3, 1, 0 }
   0xb   : > { %p561_p7 = pnand %p318_p4, %p111_p5  ;;  %p565_p8 = scmp.eq.s32.totalorder %s316_s14, 0 }
   0xc   : > { %s570_s21 = scalar_select %p85_p6, %s488_s10, %s87_s16  }
   0xd   : > { %s661_s19 = scalar_select %p561_p7, 1, 0 }
   0xe   : > { %s662_s20 = scalar_select %p565_p8, 1, 0 }
   0xf   : > { %p339_p9 = pneg %p561_p7  ;;  %s502_s22 = smov [#allocation2]  }
  0x10   : > { %s126_s23 = sshll.u32 %s502_s22, 4  ;;  %s503_s25 = smov [#allocation4]   ;;  %s127_s23 = int_to_ptr.vmem [resolvable:$true] %s126_s23 }
  0x11   : > { %p576_p10 = pnand %p565_p8, %p339_p9  ;;  %s142_s26 = sshll.u32 %s503_s25, 4  ;;  %s143_s26 = int_to_ptr.vmem [resolvable:$true] %s142_s26 }
  0x12   : > { %s398_s29 = scalar_lea.hbm %s654_s0, 256 }
  0x13   : > { %p399_p11 = scmp.ne.s32.totalorder %s654_s0, %s398_s29  ;;  %p400_p12 = pneg %p576_p10 }
  0x14   : > { %p405_p1 = scmp.lt.u32.totalorder %s398_s29, %s654_s0 }
  0x15   : > { %p401_p13 = pnand %p400_p12, %p399_p11 }
  0x17   : > { %p402_p0 = pneg %p401_p13 }
  0x19   : > { %p407_p2 = pnand %p405_p1, %p402_p0 }
  0x1b   : > { %410 = shalt.err (!%p407_p2)
}
  0x1c   : > { %s411_s6 = scalar_lea.vmem %s127_s23, 256  ;;  %p419_p9 = scmp.lt.s32.totalorder %s127_s23, %s127_s23 }
  0x1d   : > { %p412_p4 = scmp.ne.s32.totalorder %s127_s23, %s411_s6  ;;  %p420_p3 = scmp.lt.s32.totalorder %s411_s6, %s411_s6 }
  0x1f   : > { %p414_p5 = pnand %p412_p4, %p400_p12  ;;  %p421_p8 = por %p420_p3, %p419_p9 }
  0x21   : > { %p415_p6 = pneg %p414_p5 }
  0x23   : > { %p422_p7 = pnand %p421_p8, %p415_p6 }
  0x25   : > { %425 = shalt.err (!%p422_p7)
}
  0x26   : > { %s504_s7 = smov 128   ;;  %s505_s8 = smov 8  }
  0x27   : > { %342 = dma.hbm_to_vmem [thread:$0]  (!%p576_p10), %s654_s0, 256, %s127_s23, [#allocation3], %s504_s7, %s504_s7, %s505_s8  }
  0x28   : > { %s426_s25 = scalar_lea.hbm %s655_s1, 256 }
  0x29   : > { %p427_p3 = scmp.ne.s32.totalorder %s655_s1, %s426_s25  ;;  %p433_p11 = scmp.lt.u32.totalorder %s426_s25, %s655_s1 }
  0x2b   : > { %p429_p7 = pnand %p427_p3, %p400_p12 }
  0x2d   : > { %p430_p8 = pneg %p429_p7 }
  0x2f   : > { %p435_p13 = pnand %p433_p11, %p430_p8 }
  0x31   : > { %438 = shalt.err (!%p435_p13)
}
  0x32   : > { %s439_s23 = scalar_lea.vmem %s143_s26, 256  ;;  %p447_p4 = scmp.lt.s32.totalorder %s143_s26, %s143_s26 }
  0x33   : > { %p440_p0 = scmp.ne.s32.totalorder %s143_s26, %s439_s23  ;;  %p448_p5 = scmp.lt.s32.totalorder %s439_s23, %s439_s23 }
  0x35   : > { %p442_p1 = pnand %p440_p0, %p400_p12  ;;  %p449_p6 = por %p448_p5, %p447_p4 }
  0x37   : > { %p443_p2 = pneg %p442_p1 }
  0x39   : > { %p450_p9 = pnand %p449_p6, %p443_p2 }
  0x3b   : > { %453 = shalt.err (!%p450_p9)
}
  0x3c   : > { %345 = dma.hbm_to_vmem [thread:$0]  (!%p576_p10), %s655_s1, 256, %s143_s26, [#allocation5], %s504_s7, %s504_s7, %s505_s8  }
  0x3d   : > { %p664_p3 = scmp.ne.s32.totalorder %s661_s19, 0 }
  0x3e   : > { %p665_p7 = scmp.ne.s32.totalorder (!%p664_p3), %s662_s20, 0 }
  0x3f   : > { %158 = sbr.rel (%p664_p3) target bundleno = 88 (0x58), region = 28 }
  0x46   : > { %475 = dma.done.wait (%p665_p7), [#allocation3], 256  }
  0x47   : > { %477 = vsyncadd (%p665_p7), [#allocation3], 4294967040 }
  0x48   : > { %479 = dma.done.wait (%p665_p7), [#allocation5], 256  }
  0x49   : > { %481 = vsyncadd (%p665_p7), [#allocation5], 4294967040  ;;  %s175_s24 = sand.u32 1, %s484_s9   ;;  %v181_v0 = vld [vmem:[#allocation2] sm:$0xff]  ;;  %v182_v1 = vld [vmem:[#allocation2 + $0x8] sm:$0xff]  ;;  %p666_p10 = scmp.ne.s32.totalorder %s660_s17, 0 }
  0x4a   : > { %s324_s5 = sshll.u32 %s175_s24, 5  ;;  %v193_v2 = vld [vmem:[#allocation4] sm:$0x33]  ;;  %v185_v3 = vcombine.high %v181_v0, %v181_v0  ;;  %v186_v4 = vcombine.high %v182_v1, %v182_v1  ;;  %v194_v6 = vld [vmem:[#allocation4 + $0x8] sm:$0x33]  ;;  %s330_s9 = sshll.u32 (%p666_p10), %s492_s11, 4 }
  0x4b   : > { %s177_s19 = scalar_lea.vmem [#allocation6], %s324_s5  ;;  %v197_v5 = vcombine.low %v193_v2, %v193_v2  ;;  %v198_v7 = vcombine.low %v194_v6, %v194_v6  ;;  %211 = sbr.rel (!%p666_p10) target bundleno = 88 (0x58), region = 40 }
  0x4c   : > { %189 = vst [vmem:[%s177_s19] sm:$0xf] %v181_v0  ;;  %191 = vst [vmem:[%s177_s19 + $0x10] sm:$0xf] %v182_v1  ;;  %s216_s6 = scalar_lea.vmem (%p666_p10), %s656_s2, %s330_s9 }
  0x4d   : > { %202 = vst [vmem:[%s177_s19 + $0x8] sm:$0x30] %v193_v2  ;;  %204 = vst [vmem:[%s177_s19 + $0x18] sm:$0x30] %v194_v6 }
  0x4e   : > { %190 = vst [vmem:[%s177_s19 + $0x8] sm:$0xf] %v185_v3  ;;  %192 = vst [vmem:[%s177_s19 + $0x18] sm:$0xf] %v186_v4 }
  0x4f   : > { %201 = vst [vmem:[%s177_s19] sm:$0x30] %v197_v5  ;;  %203 = vst [vmem:[%s177_s19 + $0x10] sm:$0x30] %v198_v7 }
  0x55   : > { %v231_v9 = vld [vmem:[%s177_s19 + $0x8] sm:$0xff]  ;;  %v235_v11 = vld [vmem:[%s177_s19 + $0x18] sm:$0xff] }
  0x56   : > { %v229_v8 = vld [vmem:[%s177_s19] sm:$0xff]  ;;  %v233_v10 = vld [vmem:[%s177_s19 + $0x10] sm:$0xff]  ;;  %232 = vst [vmem:[%s216_s6 + $0x8] sm:$0xff] %v231_v9  ;;  %236 = vst [vmem:[%s216_s6 + $0x28] sm:$0xff] %v235_v11 }
  0x57   : > { %230 = vst [vmem:[%s216_s6] sm:$0xff] %v229_v8  ;;  %234 = vst [vmem:[%s216_s6 + $0x20] sm:$0xff] %v233_v10 }
  0x58 PF: > { %s14_s13 = sadd.s32 1, %s500_s13   ;;  %s667_s9 = smov %s488_s10 }
  0x59   : > { %p11_p12 = scmp.ge.s32.totalorder %s14_s13, 4   ;;  %s668_s10 = smov %s570_s21 }
  0x5a   : > { %s669_s11 = smov %s496_s12  ;;  %s670_s12 = smov %s672_s15 }
  0x5b   :  { %13 = sbr.rel (!%p11_p12) target bundleno = 4 (0x4), region = 89 }
  0x62   :  { %252 = vsyncpa [#allocation3], 1 }
  0x63   :  { %254 = vsyncpa [#allocation3 + $0x1], 1 }
  0x64   :  { %255 = vsyncpa [#allocation5], 1 }

</bundles_post_ra>
